<compile_context>
chip_gen: v7x
topology: tpu7x:2x2x1
jax: 0.10.0
libtpu: 0.0.40
codegen_flags: <defaults>
</compile_context>

<pallas_src>
import functools

import jax
import jax.numpy as jnp
from jax import lax
from jax.experimental import pallas as pl
from jax.experimental.pallas import tpu as pltpu


# ----------------------------------------------------------------- hw-aware constants

def _vmem_capacity_bytes() -> int:
    try:
        return int(pltpu.get_tpu_info().vmem_capacity_bytes)
    except Exception:
        return 64 * 1024 * 1024  # conservative fallback: v7x physical VMEM per TC


_VMEM_CAP = _vmem_capacity_bytes()
# Scoped VMEM we request from Mosaic: ~75% of physical, capped at 100 MiB.
#   v7x (64 MiB)      -> 48 MiB
#   v5e/v6e (128 MiB) -> 96 MiB
_VMEM_LIMIT_BYTES = min(100 * 1024 * 1024, (_VMEM_CAP * 3) // 4)
# Budget for the fused whole-MLP path (footprint estimate already carries a 2x factor).
_FUSED_VMEM_BUDGET = int(_VMEM_LIMIT_BYTES * 0.8)
# vreg-pressure cap: the inter-layer activation is a live (tb, width) f32 value.
_FUSED_MAX_WIDTH = 2048
_FUSED_TB_PREF = 256  # batch block for the fused path (enables megacore sharding on v7x)

# Tiled-path tile preferences (generation aware).
if _VMEM_CAP >= 100 * 1024 * 1024:        # v5e / v6e: 128 MiB VMEM
    _TM_PREF, _TN_PREF, _TK_PREF = 512, 1024, 2048
else:                                      # v7x: 64 MiB VMEM
    _TM_PREF, _TN_PREF, _TK_PREF = 512, 512, 1024


# ----------------------------------------------------------------------------- utils

def _round_up(x: int, m: int) -> int:
    return ((x + m - 1) // m) * m


def _sublane_align(dtype) -> int:
    return 16 if jnp.dtype(dtype).itemsize == 2 else 8


def _pad_2d(a, rows: int, cols: int):
    r, c = a.shape
    if r == rows and c == cols:
        return a
    return jnp.pad(a, ((0, rows - r), (0, cols - c)))


def _choose_tile(dim: int, pref: int, align: int):
    """Pick (tile, padded_dim): minimal padding waste, tie-break by largest tile <= pref."""
    pref = max(align, (pref // align) * align)
    dim_p = _round_up(dim, align)
    if dim_p <= pref:
        return dim_p, dim_p
    best = None  # (waste, tile, padded)
    for t in range(pref, align - 1, -align):
        padded = _round_up(dim_p, t)
        waste = padded - dim_p
        if best is None or waste < best[0]:
            best = (waste, t, padded)
        if waste == 0:           # largest zero-waste tile (scanning downward)
            break
    _, t, padded = best
    return t, padded


# ------------------------------------------------ fused whole-MLP kernel (small nets)

def _fused_mlp_kernel(*refs, n_layers: int, compute_dtype):
    # refs = (x_ref, w0_ref, b0_ref, ..., w{L-1}_ref, b{L-1}_ref, out_ref)
    x_ref = refs[0]
    out_ref = refs[1 + 2 * n_layers]
    act = x_ref[...]                                   # already compute_dtype
    for layer in range(n_layers):
        w_ref = refs[1 + 2 * layer]
        b_ref = refs[2 + 2 * layer]
        y = jnp.dot(act.astype(compute_dtype), w_ref[...],
                    preferred_element_type=jnp.float32)
        y = y + b_ref[...]                             # bias kept in f32
        if layer < n_layers - 1:                       # ReLU on all but the last layer
            y = jnp.maximum(y, 0.0)
        act = y
    out_ref[...] = act.astype(out_ref.dtype)


def fused_mlp_pallas(params, x, *, compute_dtype=jnp.bfloat16):
    """Whole forward pass in a single pallas_call; batch-gridded, lane-dense padding."""
    B, F0 = x.shape
    n_layers = len(params)
    dims = [F0] + [w.shape[1] for (w, _) in params]

    align_b = _sublane_align(compute_dtype)
    tb, Bp = _choose_tile(B, _FUSED_TB_PREF, align_b)
    dims_p = [_round_up(d, 128) for d in dims]         # lane multiples -> unmasked vst

    # Zero padding keeps the math exact (padded K rows / N cols of W and b are zero).
    xp = _pad_2d(x, Bp, dims_p[0]).astype(compute_dtype)
    flat_params = []
    in_specs = [pl.BlockSpec((tb, dims_p[0]), lambda i: (i, 0))]
    for layer, (w, b) in enumerate(params):
        wp = _pad_2d(w, dims_p[layer], dims_p[layer + 1]).astype(compute_dtype)
        bp = _pad_2d(b.reshape(1, -1).astype(jnp.float32), 1, dims_p[layer + 1])
        flat_params += [wp, bp]
        # Constant block index across the batch grid -> weights fetched once, stay resident.
        in_specs.append(pl.BlockSpec((dims_p[layer], dims_p[layer + 1]), lambda i: (0, 0)))
        in_specs.append(pl.BlockSpec((1, dims_p[layer + 1]), lambda i: (0, 0)))

    wbytes = jnp.dtype(compute_dtype).itemsize
    flops = 2 * Bp * sum(dims_p[l] * dims_p[l + 1] for l in range(n_layers))
    bytes_accessed = (
        wbytes * (Bp * dims_p[0]
                  + sum(dims_p[l] * dims_p[l + 1] for l in range(n_layers)))
        + 4 * (sum(dims_p[l + 1] for l in range(n_layers)) + Bp * dims_p[-1])
    )

    kernel = functools.partial(_fused_mlp_kernel, n_layers=n_layers,
                               compute_dtype=compute_dtype)
    out = pl.pallas_call(
        kernel,
        out_shape=jax.ShapeDtypeStruct((Bp, dims_p[-1]), x.dtype),
        grid=(Bp // tb,),
        in_specs=in_specs,
        out_specs=pl.BlockSpec((tb, dims_p[-1]), lambda i: (i, 0)),
        cost_estimate=pl.CostEstimate(
            flops=flops, transcendentals=0, bytes_accessed=bytes_accessed),
        compiler_params=pltpu.CompilerParams(
            dimension_semantics=("parallel",),
            vmem_limit_bytes=_VMEM_LIMIT_BYTES),
    )(xp, *flat_params)
    return out[:B, : dims[-1]]


# ------------------------------------------------------ tiled per-layer kernel (large)

def _tiled_linear_kernel(x_ref, w_ref, b_ref, o_ref, *, apply_relu: bool):
    k = pl.program_id(2)

    @pl.when(k == 0)
    def _init():
        o_ref[...] = jnp.zeros_like(o_ref)

    # Pure MXU work; output block (f32) is resident across the k axis and used
    # directly as the accumulator (no scratch).
    o_ref[...] += jnp.dot(x_ref[...], w_ref[...], preferred_element_type=jnp.float32)

    @pl.when(k == pl.num_programs(2) - 1)
    def _finalize():
        y = o_ref[...] + b_ref[...]
        if apply_relu:
            y = jnp.maximum(y, 0.0)
        o_ref[...] = y


def linear_pallas_tiled(x, w, b, *, apply_relu: bool, compute_dtype=jnp.bfloat16,
                        tm_pref=None, tn_pref=None, tk_pref=None):
    """Fused Linear(+ReLU) with a (tm,tn,tk) grid. x:(M,K), w:(K,N), b:(N,)."""
    M, K = x.shape
    K2, N = w.shape
    assert K == K2
    tm_pref = _TM_PREF if tm_pref is None else tm_pref
    tn_pref = _TN_PREF if tn_pref is None else tn_pref
    tk_pref = _TK_PREF if tk_pref is None else tk_pref

    align_m = _sublane_align(compute_dtype)
    tm, Mp = _choose_tile(M, tm_pref, align_m)
    tn, Np = _choose_tile(N, tn_pref, 128)
    tk, Kp = _choose_tile(K, tk_pref, 128)

    xp = _pad_2d(x, Mp, Kp).astype(compute_dtype)
    wp = _pad_2d(w, Kp, Np).astype(compute_dtype)
    bp = _pad_2d(b.reshape(1, -1).astype(jnp.float32), 1, Np)

    grid = (Mp // tm, Np // tn, Kp // tk)
    kernel = functools.partial(_tiled_linear_kernel, apply_relu=apply_relu)
    wbytes = jnp.dtype(compute_dtype).itemsize

    out = pl.pallas_call(
        kernel,
        out_shape=jax.ShapeDtypeStruct((Mp, Np), jnp.float32),
        grid_spec=pltpu.PrefetchScalarGridSpec(
            num_scalar_prefetch=0,
            grid=grid,
            in_specs=[
                pl.BlockSpec((tm, tk), lambda i, j, k: (i, k)),
                pl.BlockSpec((tk, tn), lambda i, j, k: (k, j)),
                pl.BlockSpec((1, tn), lambda i, j, k: (0, j)),
            ],
            out_specs=pl.BlockSpec((tm, tn), lambda i, j, k: (i, j)),
        ),
        cost_estimate=pl.CostEstimate(
            flops=2 * Mp * Kp * Np,
            transcendentals=0,
            bytes_accessed=wbytes * (Mp * Kp * (Np // tn) + Kp * Np * (Mp // tm))
            + 4 * (Np + Mp * Np)),
        compiler_params=pltpu.CompilerParams(
            dimension_semantics=("parallel", "parallel", "arbitrary"),
            vmem_limit_bytes=_VMEM_LIMIT_BYTES),
    )(xp, wp, bp)
    return out[:M, :N].astype(x.dtype)


# ----------------------------------------------------------------------------- module

class FullyConnectedNN:
    """JAX/Pallas equivalent of the PyTorch FullyConnected_NN forward pass.

    forward: x -> relu(fc_0(x)) -> ... -> relu(fc_{L-2}(x)) -> fc_{L-1}(x)
    """

    def __init__(self, n_input, n_output, n_units_hidden, key,
                 compute_dtype=jnp.bfloat16):
        if n_units_hidden is None:
            n_units_hidden = []
        if not isinstance(n_units_hidden, list):
            n_units_hidden = [n_units_hidden]
        n_units = [n_input] + n_units_hidden + [n_output]
        self.compute_dtype = compute_dtype

        # Deterministic init mirroring nn.Linear defaults:
        # weight, bias ~ U(-1/sqrt(fan_in), 1/sqrt(fan_in)); stored as (in, out).
        self.params = []
        for ind in range(len(n_units) - 1):
            fan_in, fan_out = n_units[ind], n_units[ind + 1]
            key, kw, kb = jax.random.split(key, 3)
            bound = 1.0 / (fan_in ** 0.5)
            w = jax.random.uniform(kw, (fan_in, fan_out), jnp.float32,
                                   minval=-bound, maxval=bound)
            b = jax.random.uniform(kb, (fan_out,), jnp.float32,
                                   minval=-bound, maxval=bound)
            self.params.append((w, b))
        # TODO(synk): the v_initial sparsification path in __init__ only edits parameter
        # values (no forward-pass ops); omitted since v_initial=None by default.

    def _fused_footprint_bytes(self, batch):
        wbytes = jnp.dtype(self.compute_dtype).itemsize
        dims = [self.params[0][0].shape[0]] + [w.shape[1] for (w, _) in self.params]
        dims_p = [_round_up(d, 128) for d in dims]
        tb, _ = _choose_tile(batch, _FUSED_TB_PREF, _sublane_align(self.compute_dtype))
        param_bytes = sum(wbytes * dims_p[l] * dims_p[l + 1] + 4 * dims_p[l + 1]
                          for l in range(len(self.params)))
        io_bytes = tb * (wbytes * dims_p[0] + 4 * dims_p[-1])
        act_bytes = 2 * 4 * tb * max(dims_p)            # two live f32 activations
        # 2x safety factor for Pallas double-buffering / internal duplication.
        return 2 * (param_bytes + io_bytes + act_bytes)

    def _use_fused(self, batch):
        dims = [self.params[0][0].shape[0]] + [w.shape[1] for (w, _) in self.params]
        if max(_round_up(d, 128) for d in dims) > _FUSED_MAX_WIDTH:
            return False                                 # vreg-pressure cap
        return self._fused_footprint_bytes(batch) <= _FUSED_VMEM_BUDGET

    def __call__(self, x):
        # Small net: one fused kernel (no HBM round-trips of intermediate activations).
        # Large net: per-layer tiled MXU kernels.
        if self._use_fused(x.shape[0]):
            return fused_mlp_pallas(self.params, x, compute_dtype=self.compute_dtype)
        n_layers = len(self.params)
        for ind, (w, b) in enumerate(self.params):
            x = linear_pallas_tiled(x, w, b, apply_relu=ind < n_layers - 1,
                                    compute_dtype=self.compute_dtype)
        return x


# -------------------------------------------------------------------------- references

def reference_forward(params, x):
    """Pure-JAX f32 reference (matches the PyTorch module numerics)."""
    n_layers = len(params)
    for ind, (w, b) in enumerate(params):
        x = jnp.dot(x, w, precision=lax.Precision.HIGHEST) + b
        if ind < n_layers - 1:
            x = jnp.maximum(x, 0.0)
    return x


def reference_forward_matched(params, x, compute_dtype):
    """Reference using the same operand casts as the kernels (bf16 x bf16 -> f32)."""
    n_layers = len(params)
    a = x
    for ind, (w, b) in enumerate(params):
        a = jnp.dot(a.astype(compute_dtype), w.astype(compute_dtype),
                    preferred_element_type=jnp.float32) + b
        if ind < n_layers - 1:
            a = jnp.maximum(a, 0.0)
    return a


if __name__ == "__main__":
    key = jax.random.PRNGKey(0)
    k_model, k_x, k_big = jax.random.split(key, 3)

    # --- small MLP -> fused single-kernel path (default bf16 operands) -----------
    n_input, n_output, n_units_hidden = 16, 8, [32, 32]
    batch = 4
    x = jax.random.normal(k_x, (batch, n_input), jnp.float32)

    model = FullyConnectedNN(n_input, n_output, n_units_hidden, k_model)
    out = jax.block_until_ready(model(x))
    ref_f32 = reference_forward(model.params, x)
    ref_match = reference_forward_matched(model.params, x, jnp.bfloat16)
    assert out.shape == (batch, n_output)
    assert jnp.allclose(out, ref_match, atol=5e-3, rtol=5e-3)
    assert jnp.allclose(out, ref_f32, atol=5e-2, rtol=5e-2)   # bf16-vs-f32 numerics gap

    # --- same net in f32 compute dtype (closer to the PyTorch f32 reference) -----
    model_f32 = FullyConnectedNN(n_input, n_output, n_units_hidden, k_model,
                                 compute_dtype=jnp.float32)
    out_f32 = jax.block_until_ready(model_f32(x))
    assert jnp.allclose(out_f32, ref_f32, atol=2e-2, rtol=2e-2)

    # --- larger, unaligned layer -> tiled grid path ------------------------------
    # Small forced tile prefs exercise _choose_tile (zero-padding tiles for 640/384)
    # and multi-step K accumulation directly into the resident output block.
    kxb, kwb, kbb = jax.random.split(k_big, 3)
    xb = jax.random.normal(kxb, (48, 640), jnp.float32)
    wb = 0.05 * jax.random.normal(kwb, (640, 384), jnp.float32)
    bb = jax.random.normal(kbb, (384,), jnp.float32)

    out_big = jax.block_until_ready(
        linear_pallas_tiled(xb, wb, bb, apply_relu=True, compute_dtype=jnp.bfloat16,
                            tm_pref=32, tn_pref=128, tk_pref=256))
    ref_big = jnp.maximum(
        jnp.dot(xb.astype(jnp.bfloat16), wb.astype(jnp.bfloat16),
                preferred_element_type=jnp.float32) + bb, 0.0)
    assert out_big.shape == (48, 384)
    assert jnp.allclose(out_big, ref_big, atol=5e-3, rtol=5e-3)

    # Default (generation-aware) tiles in f32, compared to the f32 reference.
    out_big32 = jax.block_until_ready(
        linear_pallas_tiled(xb, wb, bb, apply_relu=True, compute_dtype=jnp.float32))
    ref_big32 = jnp.maximum(
        jnp.dot(xb, wb, precision=lax.Precision.HIGHEST) + bb, 0.0)
    assert jnp.allclose(out_big32, ref_big32, atol=2e-2, rtol=2e-2)

    print("KERNEL_OK")
</pallas_src>

<mosaic_0001>
module attributes {stable_mosaic.version = 11 : i64} {
  func.func @_fused_mlp_kernel(%arg0: i32, %arg1: memref<16x128xbf16, #tpu.memory_space<vmem>>, %arg2: memref<128x128xbf16, #tpu.memory_space<vmem>>, %arg3: memref<1x128xf32, #tpu.memory_space<vmem>>, %arg4: memref<128x128xbf16, #tpu.memory_space<vmem>>, %arg5: memref<1x128xf32, #tpu.memory_space<vmem>>, %arg6: memref<128x128xbf16, #tpu.memory_space<vmem>>, %arg7: memref<1x128xf32, #tpu.memory_space<vmem>>, %arg8: memref<16x128xf32, #tpu.memory_space<vmem>>) attributes {dimension_semantics = [#tpu.dimension_semantics<parallel>], iteration_bounds = array<i64: 1>, scalar_prefetch = 0 : i64, scratch_operands = 0 : i64, tpu.core_type = #tpu.core_type<tc>, window_params = [{transform_indices = @transform_0, window_bounds = array<i64: 16, 128>}, {pipeline_mode = #tpu.pipeline_mode<synchronous>, transform_indices = @transform_1, window_bounds = array<i64: 128, 128>}, {pipeline_mode = #tpu.pipeline_mode<synchronous>, transform_indices = @transform_2, window_bounds = array<i64: 1, 128>}, {pipeline_mode = #tpu.pipeline_mode<synchronous>, transform_indices = @transform_3, window_bounds = array<i64: 128, 128>}, {pipeline_mode = #tpu.pipeline_mode<synchronous>, transform_indices = @transform_4, window_bounds = array<i64: 1, 128>}, {pipeline_mode = #tpu.pipeline_mode<synchronous>, transform_indices = @transform_5, window_bounds = array<i64: 128, 128>}, {pipeline_mode = #tpu.pipeline_mode<synchronous>, transform_indices = @transform_6, window_bounds = array<i64: 1, 128>}, {transform_indices = @transform_7, window_bounds = array<i64: 16, 128>}]} {
    %c0 = arith.constant 0 : index
    %c0_0 = arith.constant 0 : index
    %0 = vector.load %arg1[%c0, %c0_0] : memref<16x128xbf16, #tpu.memory_space<vmem>>, vector<16x128xbf16>
    %c0_1 = arith.constant 0 : index
    %c0_2 = arith.constant 0 : index
    %1 = vector.load %arg2[%c0_1, %c0_2] : memref<128x128xbf16, #tpu.memory_space<vmem>>, vector<128x128xbf16>
    %cst = arith.constant dense<0.000000e+00> : vector<16x128xf32>
    %2 = tpu.matmul %0, %1, %cst {dimension_numbers = #tpu.dot_dimension_numbers<[1], [0], [0], [1], [0, 0, 1, 1], [], []>} : vector<16x128xbf16>, vector<128x128xbf16>, vector<16x128xf32> -> vector<16x128xf32>
    %c0_3 = arith.constant 0 : index
    %c0_4 = arith.constant 0 : index
    %3 = vector.load %arg3[%c0_3, %c0_4] : memref<1x128xf32, #tpu.memory_space<vmem>>, vector<1x128xf32>
    %4 = vector.broadcast %3 : vector<1x128xf32> to vector<16x128xf32>
    %5 = arith.addf %2, %4 : vector<16x128xf32>
    %cst_5 = arith.constant 0.000000e+00 : f32
    %6 = vector.broadcast %cst_5 : f32 to vector<16x128xf32>
    %7 = arith.maximumf %5, %6 : vector<16x128xf32>
    %8 = arith.truncf %7 : vector<16x128xf32> to vector<16x128xbf16>
    %c0_6 = arith.constant 0 : index
    %c0_7 = arith.constant 0 : index
    %9 = vector.load %arg4[%c0_6, %c0_7] : memref<128x128xbf16, #tpu.memory_space<vmem>>, vector<128x128xbf16>
    %cst_8 = arith.constant dense<0.000000e+00> : vector<16x128xf32>
    %10 = tpu.matmul %8, %9, %cst_8 {dimension_numbers = #tpu.dot_dimension_numbers<[1], [0], [0], [1], [0, 0, 1, 1], [], []>} : vector<16x128xbf16>, vector<128x128xbf16>, vector<16x128xf32> -> vector<16x128xf32>
    %c0_9 = arith.constant 0 : index
    %c0_10 = arith.constant 0 : index
    %11 = vector.load %arg5[%c0_9, %c0_10] : memref<1x128xf32, #tpu.memory_space<vmem>>, vector<1x128xf32>
    %12 = vector.broadcast %11 : vector<1x128xf32> to vector<16x128xf32>
    %13 = arith.addf %10, %12 : vector<16x128xf32>
    %cst_11 = arith.constant 0.000000e+00 : f32
    %14 = vector.broadcast %cst_11 : f32 to vector<16x128xf32>
    %15 = arith.maximumf %13, %14 : vector<16x128xf32>
    %16 = arith.truncf %15 : vector<16x128xf32> to vector<16x128xbf16>
    %c0_12 = arith.constant 0 : index
    %c0_13 = arith.constant 0 : index
    %17 = vector.load %arg6[%c0_12, %c0_13] : memref<128x128xbf16, #tpu.memory_space<vmem>>, vector<128x128xbf16>
    %cst_14 = arith.constant dense<0.000000e+00> : vector<16x128xf32>
    %18 = tpu.matmul %16, %17, %cst_14 {dimension_numbers = #tpu.dot_dimension_numbers<[1], [0], [0], [1], [0, 0, 1, 1], [], []>} : vector<16x128xbf16>, vector<128x128xbf16>, vector<16x128xf32> -> vector<16x128xf32>
    %c0_15 = arith.constant 0 : index
    %c0_16 = arith.constant 0 : index
    %19 = vector.load %arg7[%c0_15, %c0_16] : memref<1x128xf32, #tpu.memory_space<vmem>>, vector<1x128xf32>
    %20 = vector.broadcast %19 : vector<1x128xf32> to vector<16x128xf32>
    %21 = arith.addf %18, %20 : vector<16x128xf32>
    %c0_17 = arith.constant 0 : index
    %c0_18 = arith.constant 0 : index
    %22 = vector.load %arg8[%c0_17, %c0_18] : memref<16x128xf32, #tpu.memory_space<vmem>>, vector<16x128xf32>
    tpu.vector_store %arg8[%c0_17, %c0_18], %21 {strides = array<i32>} : memref<16x128xf32, #tpu.memory_space<vmem>>, vector<16x128xf32>,
    return
  }
  func.func @transform_0(%arg0: i32) -> (i32, i32) {
    %c0_i32 = arith.constant 0 : i32
    %c0_i32_0 = arith.constant 0 : i32
    return %arg0, %c0_i32 : i32, i32
  }
  func.func @transform_1(%arg0: i32) -> (i32, i32) {
    %c0_i32 = arith.constant 0 : i32
    %c0_i32_0 = arith.constant 0 : i32
    %c0_i32_1 = arith.constant 0 : i32
    return %c0_i32, %c0_i32_0 : i32, i32
  }
  func.func @transform_2(%arg0: i32) -> (i32, i32) {
    %c0_i32 = arith.constant 0 : i32
    %c0_i32_0 = arith.constant 0 : i32
    %c0_i32_1 = arith.constant 0 : i32
    return %c0_i32, %c0_i32_0 : i32, i32
  }
  func.func @transform_3(%arg0: i32) -> (i32, i32) {
    %c0_i32 = arith.constant 0 : i32
    %c0_i32_0 = arith.constant 0 : i32
    %c0_i32_1 = arith.constant 0 : i32
    return %c0_i32, %c0_i32_0 : i32, i32
  }
  func.func @transform_4(%arg0: i32) -> (i32, i32) {
    %c0_i32 = arith.constant 0 : i32
    %c0_i32_0 = arith.constant 0 : i32
    %c0_i32_1 = arith.constant 0 : i32
    return %c0_i32, %c0_i32_0 : i32, i32
  }
  func.func @transform_5(%arg0: i32) -> (i32, i32) {
    %c0_i32 = arith.constant 0 : i32
    %c0_i32_0 = arith.constant 0 : i32
    %c0_i32_1 = arith.constant 0 : i32
    return %c0_i32, %c0_i32_0 : i32, i32
  }
  func.func @transform_6(%arg0: i32) -> (i32, i32) {
    %c0_i32 = arith.constant 0 : i32
    %c0_i32_0 = arith.constant 0 : i32
    %c0_i32_1 = arith.constant 0 : i32
    return %c0_i32, %c0_i32_0 : i32, i32
  }
  func.func @transform_7(%arg0: i32) -> (i32, i32) {
    %c0_i32 = arith.constant 0 : i32
    %c0_i32_0 = arith.constant 0 : i32
    return %arg0, %c0_i32 : i32, i32
  }
}

</mosaic_0001>

<bundles_post_ra>
// kernel: tpu_custom_call.1
= control target key start
LH: loop header
LB: loop body
LE: loop exit
PB: predicated region body
PF: predicated region fallthrough
CT: control target
= control target key end

     0   :  { %12 = vsyncpa [#allocation3], 0  ;;  %s899_s0 = inlined_call_operand.hbm [shape: bf16[16,128], index: 0, kind: input, shape index: {}]   ;;  %s900_s1 = inlined_call_operand.hbm [shape: bf16[128,128], index: 1, kind: input, shape index: {}]   ;;  %s901_s2 = inlined_call_operand.vmem [shape: f32[1,128], index: 2, kind: input, shape index: {}]   ;;  %s902_s3 = inlined_call_operand.hbm [shape: bf16[128,128], index: 3, kind: input, shape index: {}]   ;;  %s903_s4 = inlined_call_operand.vmem [shape: f32[1,128], index: 4, kind: input, shape index: {}]   ;;  %s904_s5 = inlined_call_operand.hbm [shape: bf16[128,128], index: 5, kind: input, shape index: {}]   ;;  %s905_s6 = inlined_call_operand.vmem [shape: f32[1,128], index: 6, kind: input, shape index: {}]   ;;  %s906_s7 = inlined_call_operand.hbm [shape: f32[16,128], index: 7, kind: output, shape index: {}]  }
   0x1   :  { %13 = vsyncpa [#allocation6], 0 }
   0x2   :  { %14 = vsyncpa [#allocation9], 0 }
   0x3   :  { %15 = vsyncpa [#allocation4], 0  ;;  %s723_s24 = smov [#allocation5]   ;;  %s724_s26 = smov [#allocation2]  }
   0x4   :  { %s33_s25 = sshll.u32 %s723_s24, 4  ;;  %s21_s27 = sshll.u32 %s724_s26, 4  ;;  %s34_s25 = int_to_ptr.vmem [resolvable:$true] %s33_s25  ;;  %s774_s27 = int_to_ptr.vmem [resolvable:$true] %s21_s27 }
   0x5   :  { %s605_s30 = scalar_lea.hbm %s900_s1, 1024 }
   0x6   :  { %p606_p0 = scmp.ne.s32.totalorder %s900_s1, %s605_s30  ;;  %p609_p1 = scmp.lt.u32.totalorder %s605_s30, %s900_s1 }
   0x8   :  { %p611_p2 = pnand %p609_p1, %p606_p0 }
   0xa   :  { %614 = shalt.err (!%p611_p2)
}
   0xb   :  { %s615_s12 = scalar_lea.vmem %s34_s25, 1024  ;;  %p620_p4 = scmp.lt.s32.totalorder %s34_s25, %s34_s25 }
   0xc   :  { %p616_p3 = scmp.ne.s32.totalorder %s34_s25, %s615_s12  ;;  %p621_p5 = scmp.lt.s32.totalorder %s615_s12, %s615_s12 }
   0xe   :  { %p622_p6 = por %p621_p5, %p620_p4 }
  0x10   :  { %p623_p7 = pnand %p622_p6, %p616_p3 }
  0x12   :  { %626 = shalt.err (!%p623_p7)
}
  0x13   :  { %s725_s13 = smov 64   ;;  %s726_s14 = smov 4  }
  0x14   :  { %39 = dma.hbm_to_vmem [thread:$0]  %s900_s1, 1024, %s34_s25, [#allocation6], %s725_s13, %s725_s13, %s726_s14  }
  0x15   :  { %s627_s19 = scalar_lea.hbm %s899_s0, 128 }
  0x16   :  { %p628_p8 = scmp.ne.s32.totalorder %s899_s0, %s627_s19  ;;  %p631_p9 = scmp.lt.u32.totalorder %s627_s19, %s899_s0 }
  0x18   :  { %p633_p10 = pnand %p631_p9, %p628_p8 }
  0x1a   :  { %636 = shalt.err (!%p633_p10)
}
  0x1b   :  { %s637_s24 = scalar_lea.vmem %s774_s27, 128  ;;  %p642_p12 = scmp.lt.s32.totalorder %s774_s27, %s774_s27 }
  0x1c   :  { %p638_p11 = scmp.ne.s32.totalorder %s774_s27, %s637_s24  ;;  %p643_p13 = scmp.lt.s32.totalorder %s637_s24, %s637_s24 }
  0x1e   :  { %p644_p0 = por %p643_p13, %p642_p12 }
  0x20   :  { %p645_p1 = pnand %p644_p0, %p638_p11 }
  0x22   :  { %648 = shalt.err (!%p645_p1)
}
  0x23   :  { %27 = dma.hbm_to_vmem [thread:$0]  %s899_s0, 128, %s774_s27, [#allocation3], %s725_s13, %s725_s13, %s726_s14  }
  0x24   :  { %s727_s26 = smov [#allocation7]   ;;  %s728_s29 = smov [#allocation8]  }
  0x25   :  { %s47_s28 = sshll.u32 %s727_s26, 4  ;;  %s61_s30 = sshll.u32 %s728_s29, 4  ;;  %s48_s28 = int_to_ptr.vmem [resolvable:$true] %s47_s28  ;;  %s811_s30 = int_to_ptr.vmem [resolvable:$true] %s61_s30 }
  0x26   :  { %s649_s10 = scalar_lea.hbm %s902_s3, 1024 }
  0x27   :  { %p650_p2 = scmp.ne.s32.totalorder %s902_s3, %s649_s10  ;;  %p653_p3 = scmp.lt.u32.totalorder %s649_s10, %s902_s3 }
  0x29   :  { %p655_p4 = pnand %p653_p3, %p650_p2 }
  0x2b   :  { %658 = shalt.err (!%p655_p4)
}
  0x2c   :  { %s659_s0 = scalar_lea.vmem %s48_s28, 1024  ;;  %p664_p6 = scmp.lt.s32.totalorder %s48_s28, %s48_s28 }
  0x2d   :  { %p660_p5 = scmp.ne.s32.totalorder %s48_s28, %s659_s0  ;;  %p665_p7 = scmp.lt.s32.totalorder %s659_s0, %s659_s0 }
  0x2f   :  { %p666_p8 = por %p665_p7, %p664_p6 }
  0x31   :  { %p667_p9 = pnand %p666_p8, %p660_p5 }
  0x33   :  { %670 = shalt.err (!%p667_p9)
}
  0x34   :  { %53 = dma.hbm_to_vmem [thread:$0]  %s902_s3, 1024, %s48_s28, [#allocation6], %s725_s13, %s725_s13, %s726_s14  }
  0x35   :  { %s671_s20 = scalar_lea.hbm %s904_s5, 1024 }
  0x36   :  { %p672_p10 = scmp.ne.s32.totalorder %s904_s5, %s671_s20  ;;  %p675_p11 = scmp.lt.u32.totalorder %s671_s20, %s904_s5 }
  0x38   :  { %p677_p12 = pnand %p675_p11, %p672_p10 }
  0x3a   :  { %680 = shalt.err (!%p677_p12)
}
  0x3b   :  { %s681_s1 = scalar_lea.vmem %s811_s30, 1024  ;;  %p686_p0 = scmp.lt.s32.totalorder %s811_s30, %s811_s30 }
  0x3c   :  { %p682_p13 = scmp.ne.s32.totalorder %s811_s30, %s681_s1  ;;  %p687_p1 = scmp.lt.s32.totalorder %s681_s1, %s681_s1 }
  0x3e   :  { %p688_p2 = por %p687_p1, %p686_p0 }
  0x40   :  { %p689_p3 = pnand %p688_p2, %p682_p13 }
  0x42   :  { %692 = shalt.err (!%p689_p3)
}
  0x43   :  { %67 = dma.hbm_to_vmem [thread:$0]  %s904_s5, 1024, %s811_s30, [#allocation9], %s725_s13, %s725_s13, %s726_s14  }
  0x44   :  { %715 = dma.done.wait [#allocation3], 128  }
  0x45   :  { %716 = vsyncadd [#allocation3], 4294967168 }
  0x46   :  { %717 = dma.done.wait [#allocation6], 2048  }
  0x47   :  { %718 = vsyncadd [#allocation6], 4294965248 }
  0x48   :  { %719 = dma.done.wait [#allocation9], 1024  }
  0x49   :  { %720 = vsyncadd [#allocation9], 4294966272  ;;  %v729_v0 = vmov 0.0   ;;  %vm730_vm0 = vmmov 0   ;;  %v580_v1 = vld [vmem:[#allocation5] sm:$0xff]   ;;  %v581_v2 = vld [vmem:[#allocation5 + $0x8] sm:$0xff]  }
  0x4a   :  { %509 = vmatprep.subr.bf16.mxu0 %v729_v0  ;;  %525 = vmatprep.mubr.msk.bf16.mxu0 %vm730_vm0, %v729_v0  ;;  %v582_v3 = vld [vmem:[#allocation5 + $0x10] sm:$0xff]   ;;  %v589_v4 = vld [vmem:[#allocation7] sm:$0xff]   ;;  %v583_v5 = vld [vmem:[#allocation5 + $0x18] sm:$0xff]   ;;  %s731_s29 = smov [#allocation10]  }
  0x4b   :  { %529 = vmatprep.subr.bf16.mxu1 %v729_v0  ;;  %545 = vmatprep.mubr.msk.bf16.mxu1 %vm730_vm0, %v729_v0  ;;  %v590_v6 = vld [vmem:[#allocation7 + $0x8] sm:$0xff]   ;;  %v584_v7 = vld [vmem:[#allocation5 + $0x20] sm:$0xff]   ;;  %v591_v8 = vld [vmem:[#allocation7 + $0x10] sm:$0xff]   ;;  %s440_s30 = sshll.u32 %s731_s29, 4  ;;  %s441_s30 = int_to_ptr.vmem [resolvable:$true] %s440_s30 }
  0x4c   :  { %510 = vmatpush3.bf16.msra.mxu0 %v580_v1  ;;  %530 = vmatpush3.bf16.msra.mxu1 %v589_v4  ;;  %v585_v9 = vld [vmem:[#allocation5 + $0x28] sm:$0xff]   ;;  %v592_v10 = vld [vmem:[#allocation7 + $0x18] sm:$0xff]   ;;  %v586_v11 = vld [vmem:[#allocation5 + $0x30] sm:$0xff]   ;;  %p698_p5 = scmp.lt.s32.totalorder %s441_s30, %s441_s30 }
  0x4d   :  { %511 = vmatprep.subr.bf16.mxu0 %v729_v0  ;;  %531 = vmatprep.subr.bf16.mxu1 %v729_v0  ;;  %v593_v12 = vld [vmem:[#allocation7 + $0x20] sm:$0xff]   ;;  %v587_v13 = vld [vmem:[#allocation5 + $0x38] sm:$0xff]   ;;  %v594_v14 = vld [vmem:[#allocation7 + $0x28] sm:$0xff]  }
  0x4e   :  { %v588_v15 = vld [vmem:[#allocation2] sm:$0xff]   ;;  %v595_v16 = vld [vmem:[#allocation7 + $0x30] sm:$0xff]   ;;  %v597_v18 = vld [vmem:[#allocation8] sm:$0xff]  }
  0x4f   :  { %v596_v17 = vld [vmem:[#allocation7 + $0x38] sm:$0xff]   ;;  %v598_v19 = vld [vmem:[#allocation8 + $0x8] sm:$0xff]   ;;  %v599_v20 = vld [vmem:[#allocation8 + $0x10] sm:$0xff]  }
  0x50   :  { %512 = vmatpush3.bf16.msra.mxu0 %v581_v2  ;;  %532 = vmatpush3.bf16.msra.mxu1 %v590_v6  ;;  %v600_v21 = vld [vmem:[#allocation8 + $0x18] sm:$0xff]   ;;  %v601_v22 = vld [vmem:[#allocation8 + $0x20] sm:$0xff]   ;;  %v602_v23 = vld [vmem:[#allocation8 + $0x28] sm:$0xff]  }
  0x51   :  { %513 = vmatprep.subr.bf16.mxu0 %v729_v0  ;;  %533 = vmatprep.subr.bf16.mxu1 %v729_v0  ;;  %v454_v24 = vld [vmem:[%s901_s2] ss:$0 sm:$0xff]  ;;  %v603_v34 = vld [vmem:[#allocation8 + $0x30] sm:$0xff]  }
  0x52   :  { %v604_v35 = vld [vmem:[#allocation8 + $0x38] sm:$0xff]  }
  0x53   :  { %v464_v36 = vld [vmem:[%s903_s4] ss:$0 sm:$0xff]  ;;  %s693_s4 = scalar_lea.vmem %s441_s30, 256 }
  0x54   :  { %514 = vmatpush3.bf16.msra.mxu0 %v582_v3  ;;  %534 = vmatpush3.bf16.msra.mxu1 %v591_v8  ;;  %v473_v46 = vld [vmem:[%s905_s6] ss:$0 sm:$0xff]  ;;  %p694_p4 = scmp.ne.s32.totalorder %s441_s30, %s693_s4  ;;  %p699_p6 = scmp.lt.s32.totalorder %s693_s4, %s693_s4 }
  0x55   :  { %515 = vmatprep.subr.bf16.mxu0 %v729_v0  ;;  %535 = vmatprep.subr.bf16.mxu1 %v729_v0 }
  0x56   :  { %p700_p7 = por %p699_p6, %p698_p5 }
  0x58   :  { %516 = vmatpush3.bf16.msra.mxu0 %v583_v5  ;;  %536 = vmatpush3.bf16.msra.mxu1 %v592_v10  ;;  %p701_p8 = pnand %p700_p7, %p694_p4 }
  0x59   :  { %517 = vmatprep.subr.bf16.mxu0 %v729_v0  ;;  %537 = vmatprep.subr.bf16.mxu1 %v729_v0 }
  0x5c   :  { %518 = vmatpush3.bf16.msra.mxu0 %v584_v7  ;;  %538 = vmatpush3.bf16.msra.mxu1 %v593_v12 }
  0x5d   :  { %519 = vmatprep.subr.bf16.mxu0 %v729_v0  ;;  %539 = vmatprep.subr.bf16.mxu1 %v729_v0 }
  0x60   :  { %520 = vmatpush3.bf16.msra.mxu0 %v585_v9  ;;  %540 = vmatpush3.bf16.msra.mxu1 %v594_v14 }
  0x61   :  { %521 = vmatprep.subr.bf16.mxu0 %v729_v0  ;;  %541 = vmatprep.subr.bf16.mxu1 %v729_v0 }
  0x64   :  { %522 = vmatpush3.bf16.msra.mxu0 %v586_v11  ;;  %542 = vmatpush3.bf16.msra.mxu1 %v595_v16 }
  0x65   :  { %523 = vmatprep.subr.bf16.mxu0 %v729_v0  ;;  %543 = vmatprep.subr.bf16.mxu1 %v729_v0 }
  0x68   :  { %524 = vmatpush3.bf16.msra.mxu0 %v587_v13  ;;  %544 = vmatpush3.bf16.msra.mxu1 %v596_v17 }
  0x69   :  { %549 = vmatprep.subr.bf16.mxu0 %v729_v0 }
  0x6b   :  { %526 = vmatmul.mubr.bf16.vlgmr.msra.gmra.mrb[0].mxu0 %v588_v15 }
  0x6c   :  { %565 = vmatprep.mubr.msk.bf16.mxu0 %vm730_vm0, %v729_v0  ;;  %550 = vmatpush3.bf16.msra.mxu0 %v597_v18 }
  0x6d   :  { %551 = vmatprep.subr.bf16.mxu0 %v729_v0 }
  0x70   :  { %552 = vmatpush3.bf16.msra.mxu0 %v598_v19 }
  0x71   :  { %553 = vmatprep.subr.bf16.mxu0 %v729_v0 }
  0x74   :  { %554 = vmatpush3.bf16.msra.mxu0 %v599_v20 }
  0x75   :  { %555 = vmatprep.subr.bf16.mxu0 %v729_v0 }
  0x78   :  { %556 = vmatpush3.bf16.msra.mxu0 %v600_v21 }
  0x79   :  { %557 = vmatprep.subr.bf16.mxu0 %v729_v0 }
  0x7c   :  { %558 = vmatpush3.bf16.msra.mxu0 %v601_v22 }
  0x7d   :  { %559 = vmatprep.subr.bf16.mxu0 %v729_v0 }
  0x80   :  { %560 = vmatpush3.bf16.msra.mxu0 %v602_v23 }
  0x81   :  { %561 = vmatprep.subr.bf16.mxu0 %v729_v0 }
  0x84   :  { %562 = vmatpush3.bf16.msra.mxu0 %v603_v34 }
  0x85   :  { %563 = vmatprep.subr.bf16.mxu0 %v729_v0 }
  0x88   :  { %564 = vmatpush3.bf16.msra.mxu0 %v604_v35 }
 0x13e   :  { %v196_v25 = vpop.f32.mrb[0].mxu0 }
 0x13f   :  { %v197_v26 = vadd.f32 %v454_v24, %v196_v25  ;;  %v527_v27 = vpop.f32.mrb[1].mxu0 }
 0x140   :  { %v199_v28 = vpop.f32.mrb[2].mxu0 }
 0x141   :  { %v200_v29 = vadd.f32 %v454_v24, %v199_v28  ;;  %v528_v30 = vpop.f32.mrb[3].mxu0  ;;  %v203_v31 = vmax.f32 %v197_v26, 0.0 }
 0x143   :  { %v204_v32 = vmax.f32 %v200_v29, 0.0 }
 0x145   :  { %v205_v33 = vpack.c.bf16 %v204_v32, %v203_v31 }
 0x147   :  { %546 = vmatmul.mubr.bf16.vlgmr.msra.gmra.mrb[0].mxu1 %v205_v33 }
 0x21a   :  { %v311_v37 = vpop.f32.mrb[0].mxu1 }
 0x21b   :  { %v312_v38 = vadd.f32 %v464_v36, %v311_v37  ;;  %v547_v39 = vpop.f32.mrb[1].mxu1 }
 0x21c   :  { %v314_v40 = vpop.f32.mrb[2].mxu1 }
 0x21d   :  { %v315_v41 = vadd.f32 %v464_v36, %v314_v40  ;;  %v548_v42 = vpop.f32.mrb[3].mxu1  ;;  %v318_v43 = vmax.f32 %v312_v38, 0.0 }
 0x21f   :  { %v319_v44 = vmax.f32 %v315_v41, 0.0 }
 0x221   :  { %v320_v45 = vpack.c.bf16 %v319_v44, %v318_v43 }
 0x223   :  { %566 = vmatmul.mubr.bf16.vlgmr.msra.gmra.mrb[4].mxu0 %v320_v45 }
 0x2f6   :  { %v426_v47 = vpop.f32.mrb[4].mxu0 }
 0x2f7   :  { %v427_v48 = vadd.f32 %v473_v46, %v426_v47  ;;  %v567_v49 = vpop.f32.mrb[5].mxu0 }
 0x2f8   :  { %v429_v50 = vpop.f32.mrb[6].mxu0 }
 0x2f9   :  { %433 = vst [vmem:[#allocation10] sm:$0xff] %v427_v48  ;;  %v430_v51 = vadd.f32 %v473_v46, %v429_v50  ;;  %v568_v52 = vpop.f32.mrb[7].mxu0 }
 0x2fb   :  { %434 = vst [vmem:[#allocation10 + $0x8] sm:$0xff] %v430_v51 }
 0x2fc   :  { %704 = shalt.err (!%p701_p8)
}
 0x2fd   :  { %s705_s9 = scalar_lea.hbm %s906_s7, 256 }
 0x2fe   :  { %p706_p9 = scmp.ne.s32.totalorder %s906_s7, %s705_s9  ;;  %p709_p10 = scmp.lt.u32.totalorder %s705_s9, %s906_s7 }
 0x300   :  { %p711_p11 = pnand %p709_p10, %p706_p9 }
 0x302   :  { %714 = shalt.err (!%p711_p11)
}
 0x303   :  { %s732_s16 = smov 128   ;;  %s733_s0 = smov 8  }
 0x304   :  { %446 = dma.vmem_to_hbm [thread:$0]  %s441_s30, 256, %s906_s7, [#allocation4], %s732_s16, %s732_s16, %s733_s0  }
 0x305   :  { %721 = dma.done.wait [#allocation4], 256  }
 0x306   :  { %722 = vsyncadd [#allocation4], 4294967040 }
 0x307   :  { %450 = vsyncpa [#allocation3], 1 }
 0x308   :  { %451 = vsyncpa [#allocation6], 1 }
 0x309   :  { %452 = vsyncpa [#allocation9], 1 }
 0x30a   :  { %453 = vsyncpa [#allocation4], 1 }

</bundles_post_ra>
